<compile_context>
chip_gen: v7x
topology: tpu7x:2x2x1
jax: 0.10.0
libtpu: 0.0.40
codegen_flags: <defaults>
</compile_context>

<pallas_src>
import jax
import jax.numpy as jnp
from jax.experimental import pallas as pl
from jax.experimental.pallas import tpu as pltpu

F_IN = 100    # feature width fixed by the module
F_PAD = 128   # lane-aligned padded width for the resident weights


def _round_up(n, m):
    return ((n + m - 1) // m) * m


def shallow_mlp_kernel(x_ref, w1_ref, b1_ref, w2_ref, b2_ref, w3_ref, b3_ref, o_ref):
    x = x_ref[...]                                   # [TB, 100] bf16

    # layer1 + ReLU  ->  [TB, 128]  (padded lanes are exactly 0: zero W cols, zero bias)
    h1 = jnp.dot(x, w1_ref[...], preferred_element_type=jnp.float32) + b1_ref[...]
    h1 = jnp.maximum(h1, 0.0).astype(jnp.bfloat16)   # bf16 for the next MXU pass

    # layer2 + ReLU  ->  [TB, 128]  (padded lanes stay 0)
    h2 = jnp.dot(h1, w2_ref[...], preferred_element_type=jnp.float32) + b2_ref[...]
    h2 = jnp.maximum(h2, 0.0)                        # f32

    # output layer (N=1): VPU multiply + lane reduction instead of a 1-column matmul
    logits = jnp.sum(h2 * w3_ref[...], axis=-1, keepdims=True) + b3_ref[...]  # [TB, 1]
    o_ref[...] = jax.nn.sigmoid(logits).astype(o_ref.dtype)


def shallow_forward(x, packed_params, *, tb_max=512, input_dtype=jnp.bfloat16):
    """x: [B, 100] float32 -> [B, 1] float32."""
    w1p, b1p, w2p, b2p, w3p, b3p = packed_params
    B, F = x.shape
    assert F == F_IN, F

    x = x.astype(input_dtype)                       # halve dominant HBM traffic

    TB = min(tb_max, _round_up(B, 8))               # batch tile, multiple of 8
    grid = (pl.cdiv(B, TB),)                        # ragged last tile handled by Pallas

    def const_spec(shape):
        return pl.BlockSpec(shape, lambda i: (0, 0))    # resident: DMA'd once

    flops = 2 * B * (F_IN * F_PAD + F_PAD * F_PAD + F_PAD)
    bytes_accessed = (
        B * F_IN * jnp.dtype(input_dtype).itemsize
        + sum(int(p.size) * p.dtype.itemsize for p in packed_params)
        + B * 4
    )
    cost = pl.CostEstimate(flops=flops, transcendentals=B, bytes_accessed=bytes_accessed)

    return pl.pallas_call(
        shallow_mlp_kernel,
        out_shape=jax.ShapeDtypeStruct((B, 1), jnp.float32),
        grid=grid,
        in_specs=[
            pl.BlockSpec((TB, F_IN), lambda i: (i, 0)),   # x: streamed batch tiles
            const_spec((F_IN, F_PAD)),                    # w1 (padded N), bf16
            const_spec((1, F_PAD)),                       # b1, f32
            const_spec((F_PAD, F_PAD)),                   # w2 (padded K and N), bf16
            const_spec((1, F_PAD)),                       # b2, f32
            const_spec((1, F_PAD)),                       # w3 as a row vector, f32
            const_spec((1, 1)),                           # b3, f32
        ],
        out_specs=pl.BlockSpec((TB, 1), lambda i: (i, 0)),
        compiler_params=pltpu.CompilerParams(dimension_semantics=("parallel",)),
        cost_estimate=cost,
    )(x, w1p, b1p, w2p, b2p, w3p, b3p)


def init_params(key):
    """Deterministic init mimicking PyTorch's default Linear init
    (uniform in +-1/sqrt(fan_in)). Weights stored as [in, out], biases 1-D."""
    def linear(key, fan_in, fan_out):
        kw, kb = jax.random.split(key)
        bound = 1.0 / jnp.sqrt(jnp.float32(fan_in))
        w = jax.random.uniform(kw, (fan_in, fan_out), jnp.float32, -bound, bound)
        b = jax.random.uniform(kb, (fan_out,), jnp.float32, -bound, bound)
        return w, b

    k1, k2, k3 = jax.random.split(key, 3)
    w1, b1 = linear(k1, 100, 100)
    w2, b2 = linear(k2, 100, 100)
    w3, b3 = linear(k3, 100, 1)
    return (w1, b1, w2, b2, w3, b3)


def pack_params(params):
    """Zero-pad the resident parameters to lane-aligned shapes (padded lanes MUST be
    zero so they stay inert through layers 2/3).  MXU weights are stored in bf16."""
    w1, b1, w2, b2, w3, b3 = params
    w1p = (jnp.zeros((F_IN, F_PAD), jnp.float32).at[:, :F_IN].set(w1)
           .astype(jnp.bfloat16))                                            # [100,128]
    b1p = jnp.zeros((1, F_PAD), jnp.float32).at[0, :F_IN].set(b1)            # [1,128]
    w2p = (jnp.zeros((F_PAD, F_PAD), jnp.float32).at[:F_IN, :F_IN].set(w2)
           .astype(jnp.bfloat16))                                            # [128,128]
    b2p = jnp.zeros((1, F_PAD), jnp.float32).at[0, :F_IN].set(b2)            # [1,128]
    w3p = jnp.zeros((1, F_PAD), jnp.float32).at[0, :F_IN].set(w3[:, 0])      # [1,128]
    b3p = jnp.reshape(b3, (1, 1)).astype(jnp.float32)                        # [1,1]
    return (w1p, b1p, w2p, b2p, w3p, b3p)


def reference_forward(x, params):
    """Pure-f32 reference (module semantics)."""
    w1, b1, w2, b2, w3, b3 = params
    h1 = jnp.maximum(x @ w1 + b1, 0.0)
    h2 = jnp.maximum(h1 @ w2 + b2, 0.0)
    return jax.nn.sigmoid(h2 @ w3 + b3)


def reference_forward_mixed(x, params):
    """Reference replicating the kernel's numerics (bf16 MXU operands, f32 accum)."""
    w1, b1, w2, b2, w3, b3 = params
    q = lambda a: a.astype(jnp.bfloat16).astype(jnp.float32)
    h1 = jnp.maximum(q(x) @ q(w1) + b1, 0.0)
    h2 = jnp.maximum(q(h1) @ q(w2) + b2, 0.0)
    return jax.nn.sigmoid(h2 @ w3 + b3)


if __name__ == "__main__":
    key = jax.random.PRNGKey(0)
    kx, kp = jax.random.split(key)

    B = 8  # small batch; feature dim fixed at 100 by the module definition
    x = jax.random.normal(kx, (B, 100), jnp.float32)
    params = init_params(kp)
    packed = pack_params(params)

    out = shallow_forward(x, packed)
    out = jax.block_until_ready(out)

    assert out.shape == (B, 1), out.shape
    assert out.dtype == jnp.float32, out.dtype

    # Tight check vs a reference that mimics the kernel's bf16/f32 mixed precision.
    ref_mixed = reference_forward_mixed(x, params)
    err_mixed = float(jnp.max(jnp.abs(out - ref_mixed)))
    assert jnp.allclose(out, ref_mixed, atol=2e-3, rtol=0.0), f"mixed-precision mismatch: {err_mixed}"

    # Looser sanity check vs the pure-f32 module semantics.
    ref_f32 = reference_forward(x, params)
    err_f32 = float(jnp.max(jnp.abs(out - ref_f32)))
    assert jnp.allclose(out, ref_f32, atol=5e-2, rtol=0.0), f"f32-semantics mismatch: {err_f32}"

    print("KERNEL_OK")
</pallas_src>

<mosaic_0001>
module attributes {stable_mosaic.version = 11 : i64} {
  func.func @shallow_mlp_kernel(%arg0: i32, %arg1: memref<8x100xbf16, #tpu.memory_space<vmem>>, %arg2: memref<100x128xbf16, #tpu.memory_space<vmem>>, %arg3: memref<1x128xf32, #tpu.memory_space<vmem>>, %arg4: memref<128x128xbf16, #tpu.memory_space<vmem>>, %arg5: memref<1x128xf32, #tpu.memory_space<vmem>>, %arg6: memref<1x128xf32, #tpu.memory_space<vmem>>, %arg7: memref<1x1xf32, #tpu.memory_space<vmem>>, %arg8: memref<8x1xf32, #tpu.memory_space<vmem>>) attributes {dimension_semantics = [#tpu.dimension_semantics<parallel>], iteration_bounds = array<i64: 1>, scalar_prefetch = 0 : i64, scratch_operands = 0 : i64, tpu.core_type = #tpu.core_type<tc>, window_params = [{transform_indices = @transform_0, window_bounds = array<i64: 8, 100>}, {pipeline_mode = #tpu.pipeline_mode<synchronous>, transform_indices = @transform_1, window_bounds = array<i64: 100, 128>}, {pipeline_mode = #tpu.pipeline_mode<synchronous>, transform_indices = @transform_2, window_bounds = array<i64: 1, 128>}, {pipeline_mode = #tpu.pipeline_mode<synchronous>, transform_indices = @transform_3, window_bounds = array<i64: 128, 128>}, {pipeline_mode = #tpu.pipeline_mode<synchronous>, transform_indices = @transform_4, window_bounds = array<i64: 1, 128>}, {pipeline_mode = #tpu.pipeline_mode<synchronous>, transform_indices = @transform_5, window_bounds = array<i64: 1, 128>}, {pipeline_mode = #tpu.pipeline_mode<synchronous>, transform_indices = @transform_6, window_bounds = array<i64: 1, 1>}, {transform_indices = @transform_7, window_bounds = array<i64: 8, 1>}]} {
    %c0 = arith.constant 0 : index
    %c0_0 = arith.constant 0 : index
    %0 = vector.load %arg1[%c0, %c0_0] : memref<8x100xbf16, #tpu.memory_space<vmem>>, vector<8x100xbf16>
    %c0_1 = arith.constant 0 : index
    %c0_2 = arith.constant 0 : index
    %1 = vector.load %arg2[%c0_1, %c0_2] : memref<100x128xbf16, #tpu.memory_space<vmem>>, vector<100x128xbf16>
    %cst = arith.constant dense<0.000000e+00> : vector<8x128xf32>
    %2 = tpu.matmul %0, %1, %cst {dimension_numbers = #tpu.dot_dimension_numbers<[1], [0], [0], [1], [0, 0, 1, 1], [], []>} : vector<8x100xbf16>, vector<100x128xbf16>, vector<8x128xf32> -> vector<8x128xf32>
    %c0_3 = arith.constant 0 : index
    %c0_4 = arith.constant 0 : index
    %3 = vector.load %arg3[%c0_3, %c0_4] : memref<1x128xf32, #tpu.memory_space<vmem>>, vector<1x128xf32>
    %4 = vector.broadcast %3 : vector<1x128xf32> to vector<8x128xf32>
    %5 = arith.addf %2, %4 : vector<8x128xf32>
    %cst_5 = arith.constant 0.000000e+00 : f32
    %6 = vector.broadcast %cst_5 : f32 to vector<8x128xf32>
    %7 = arith.maximumf %5, %6 : vector<8x128xf32>
    %8 = arith.truncf %7 : vector<8x128xf32> to vector<8x128xbf16>
    %c0_6 = arith.constant 0 : index
    %c0_7 = arith.constant 0 : index
    %9 = vector.load %arg4[%c0_6, %c0_7] : memref<128x128xbf16, #tpu.memory_space<vmem>>, vector<128x128xbf16>
    %cst_8 = arith.constant dense<0.000000e+00> : vector<8x128xf32>
    %10 = tpu.matmul %8, %9, %cst_8 {dimension_numbers = #tpu.dot_dimension_numbers<[1], [0], [0], [1], [0, 0, 1, 1], [], []>} : vector<8x128xbf16>, vector<128x128xbf16>, vector<8x128xf32> -> vector<8x128xf32>
    %c0_9 = arith.constant 0 : index
    %c0_10 = arith.constant 0 : index
    %11 = vector.load %arg5[%c0_9, %c0_10] : memref<1x128xf32, #tpu.memory_space<vmem>>, vector<1x128xf32>
    %12 = vector.broadcast %11 : vector<1x128xf32> to vector<8x128xf32>
    %13 = arith.addf %10, %12 : vector<8x128xf32>
    %cst_11 = arith.constant 0.000000e+00 : f32
    %14 = vector.broadcast %cst_11 : f32 to vector<8x128xf32>
    %15 = arith.maximumf %13, %14 : vector<8x128xf32>
    %c0_12 = arith.constant 0 : index
    %c0_13 = arith.constant 0 : index
    %16 = vector.load %arg6[%c0_12, %c0_13] : memref<1x128xf32, #tpu.memory_space<vmem>>, vector<1x128xf32>
    %17 = vector.broadcast %16 : vector<1x128xf32> to vector<8x128xf32>
    %18 = arith.mulf %15, %17 : vector<8x128xf32>
    %cst_14 = arith.constant dense<0.000000e+00> : vector<8xf32>
    %19 = vector.multi_reduction <add>, %18, %cst_14 [1] : vector<8x128xf32> to vector<8xf32>
    %20 = vector.shape_cast %19 : vector<8xf32> to vector<8x1xf32>
    %c0_15 = arith.constant 0 : index
    %c0_16 = arith.constant 0 : index
    %21 = vector.load %arg7[%c0_15, %c0_16] : memref<1x1xf32, #tpu.memory_space<vmem>>, vector<1x1xf32>
    %22 = vector.broadcast %21 : vector<1x1xf32> to vector<8x1xf32>
    %23 = arith.addf %20, %22 : vector<8x1xf32>
    %24 = arith.negf %23 : vector<8x1xf32>
    %25 = math.exp %24 : vector<8x1xf32>
    %cst_17 = arith.constant 1.000000e+00 : f32
    %26 = vector.broadcast %cst_17 : f32 to vector<8x1xf32>
    %27 = arith.addf %26, %25 : vector<8x1xf32>
    %28 = arith.divf %26, %27 : vector<8x1xf32>
    %c0_18 = arith.constant 0 : index
    %c0_19 = arith.constant 0 : index
    %29 = vector.load %arg8[%c0_18, %c0_19] : memref<8x1xf32, #tpu.memory_space<vmem>>, vector<8x1xf32>
    tpu.vector_store %arg8[%c0_18, %c0_19], %28 {strides = array<i32>} : memref<8x1xf32, #tpu.memory_space<vmem>>, vector<8x1xf32>,
    return
  }
  func.func @transform_0(%arg0: i32) -> (i32, i32) {
    %c0_i32 = arith.constant 0 : i32
    %c0_i32_0 = arith.constant 0 : i32
    return %arg0, %c0_i32 : i32, i32
  }
  func.func @transform_1(%arg0: i32) -> (i32, i32) {
    %c0_i32 = arith.constant 0 : i32
    %c0_i32_0 = arith.constant 0 : i32
    %c0_i32_1 = arith.constant 0 : i32
    return %c0_i32, %c0_i32_0 : i32, i32
  }
  func.func @transform_2(%arg0: i32) -> (i32, i32) {
    %c0_i32 = arith.constant 0 : i32
    %c0_i32_0 = arith.constant 0 : i32
    %c0_i32_1 = arith.constant 0 : i32
    return %c0_i32, %c0_i32_0 : i32, i32
  }
  func.func @transform_3(%arg0: i32) -> (i32, i32) {
    %c0_i32 = arith.constant 0 : i32
    %c0_i32_0 = arith.constant 0 : i32
    %c0_i32_1 = arith.constant 0 : i32
    return %c0_i32, %c0_i32_0 : i32, i32
  }
  func.func @transform_4(%arg0: i32) -> (i32, i32) {
    %c0_i32 = arith.constant 0 : i32
    %c0_i32_0 = arith.constant 0 : i32
    %c0_i32_1 = arith.constant 0 : i32
    return %c0_i32, %c0_i32_0 : i32, i32
  }
  func.func @transform_5(%arg0: i32) -> (i32, i32) {
    %c0_i32 = arith.constant 0 : i32
    %c0_i32_0 = arith.constant 0 : i32
    %c0_i32_1 = arith.constant 0 : i32
    return %c0_i32, %c0_i32_0 : i32, i32
  }
  func.func @transform_6(%arg0: i32) -> (i32, i32) {
    %c0_i32 = arith.constant 0 : i32
    %c0_i32_0 = arith.constant 0 : i32
    %c0_i32_1 = arith.constant 0 : i32
    return %c0_i32, %c0_i32_0 : i32, i32
  }
  func.func @transform_7(%arg0: i32) -> (i32, i32) {
    %c0_i32 = arith.constant 0 : i32
    %c0_i32_0 = arith.constant 0 : i32
    return %arg0, %c0_i32 : i32, i32
  }
}

</mosaic_0001>

<bundles_post_ra>
// kernel: tpu_custom_call.1
= control target key start
LH: loop header
LB: loop body
LE: loop exit
PB: predicated region body
PF: predicated region fallthrough
CT: control target
= control target key end

     0   :  { %s598_s0 = inlined_call_operand.hbm [shape: bf16[8,100], index: 0, kind: input, shape index: {}]   ;;  %s599_s1 = inlined_call_operand.hbm [shape: bf16[100,128], index: 1, kind: input, shape index: {}]   ;;  %s600_s2 = inlined_call_operand.vmem [shape: f32[1,128], index: 2, kind: input, shape index: {}]   ;;  %s601_s3 = inlined_call_operand.hbm [shape: bf16[128,128], index: 3, kind: input, shape index: {}]   ;;  %s602_s4 = inlined_call_operand.vmem [shape: f32[1,128], index: 4, kind: input, shape index: {}]   ;;  %s603_s5 = inlined_call_operand.vmem [shape: f32[1,128], index: 5, kind: input, shape index: {}]   ;;  %s604_s6 = inlined_call_operand.<no memory space> [shape: f32[1,1], index: 6, kind: input, shape index: {}]   ;;  %s605_s7 = inlined_call_operand.vmem [shape: f32[8,1], index: 7, kind: output, shape index: {}]  }
   0x1   :  { %v12_v0 = vstv %s604_s6 }
   0x2   :  { %13 = vst [vmem:[#allocation2] sm:$0x1] %v12_v0 }
   0x3   :  { %14 = vsyncpa [#allocation4], 0 }
   0x4   :  { %15 = vsyncpa [#allocation6], 0  ;;  %s494_s26 = smov [#allocation5]   ;;  %s424_s30 = scalar_lea.hbm %s599_s1, 832 }
   0x5   :  { %s31_s27 = sshll.u32 %s494_s26, 4  ;;  %p425_p0 = scmp.ne.s32.totalorder %s599_s1, %s424_s30  ;;  %s32_s27 = int_to_ptr.vmem [resolvable:$true] %s31_s27 }
   0x6   :  { %p428_p1 = scmp.lt.u32.totalorder %s424_s30, %s599_s1 }
   0x8   :  { %p430_p2 = pnand %p428_p1, %p425_p0 }
   0xa   :  { %433 = shalt.err (!%p430_p2)
}
   0xb   :  { %s434_s6 = scalar_lea.vmem %s32_s27, 832  ;;  %p439_p4 = scmp.lt.s32.totalorder %s32_s27, %s32_s27 }
   0xc   :  { %p435_p3 = scmp.ne.s32.totalorder %s32_s27, %s434_s6  ;;  %p440_p5 = scmp.lt.s32.totalorder %s434_s6, %s434_s6 }
   0xe   :  { %p441_p6 = por %p440_p5, %p439_p4 }
  0x10   :  { %p442_p7 = pnand %p441_p6, %p435_p3 }
  0x12   :  { %445 = shalt.err (!%p442_p7)
}
  0x13   :  { %s495_s12 = smov 64   ;;  %s496_s13 = smov 4  }
  0x14   :  { %37 = dma.hbm_to_vmem [thread:$0]  %s599_s1, 832, %s32_s27, [#allocation6], %s495_s12, %s495_s12, %s496_s13  }
  0x15   :  { %s497_s16 = smov [#allocation3]   ;;  %s498_s18 = smov [#allocation7]  }
  0x16   :  { %s22_s17 = sshll.u32 %s497_s16, 4  ;;  %s45_s19 = sshll.u32 %s498_s18, 4  ;;  %s23_s17 = int_to_ptr.vmem [resolvable:$true] %s22_s17  ;;  %s46_s19 = int_to_ptr.vmem [resolvable:$true] %s45_s19 }
  0x17   :  { %s446_s22 = scalar_lea.hbm %s598_s0, 64 }
  0x18   :  { %p447_p8 = scmp.ne.s32.totalorder %s598_s0, %s446_s22  ;;  %p450_p9 = scmp.lt.u32.totalorder %s446_s22, %s598_s0 }
  0x1a   :  { %p452_p10 = pnand %p450_p9, %p447_p8 }
  0x1c   :  { %455 = shalt.err (!%p452_p10)
}
  0x1d   :  { %s456_s1 = scalar_lea.vmem %s23_s17, 64  ;;  %p461_p12 = scmp.lt.s32.totalorder %s23_s17, %s23_s17 }
  0x1e   :  { %p457_p11 = scmp.ne.s32.totalorder %s23_s17, %s456_s1  ;;  %p462_p13 = scmp.lt.s32.totalorder %s456_s1, %s456_s1 }
  0x20   :  { %p463_p0 = por %p462_p13, %p461_p12 }
  0x22   :  { %p464_p1 = pnand %p463_p0, %p457_p11 }
  0x24   :  { %467 = shalt.err (!%p464_p1)
}
  0x25   :  { %25 = dma.hbm_to_vmem [thread:$0]  %s598_s0, 64, %s23_s17, [#allocation4]  }
  0x26   :  { %s468_s8 = scalar_lea.hbm %s601_s3, 1024 }
  0x27   :  { %p469_p2 = scmp.ne.s32.totalorder %s601_s3, %s468_s8  ;;  %p472_p3 = scmp.lt.u32.totalorder %s468_s8, %s601_s3 }
  0x29   :  { %p474_p4 = pnand %p472_p3, %p469_p2 }
  0x2b   :  { %477 = shalt.err (!%p474_p4)
}
  0x2c   :  { %s478_s14 = scalar_lea.vmem %s46_s19, 1024  ;;  %p483_p6 = scmp.lt.s32.totalorder %s46_s19, %s46_s19 }
  0x2d   :  { %p479_p5 = scmp.ne.s32.totalorder %s46_s19, %s478_s14  ;;  %p484_p7 = scmp.lt.s32.totalorder %s478_s14, %s478_s14 }
  0x2f   :  { %p485_p8 = por %p484_p7, %p483_p6 }
  0x31   :  { %p486_p9 = pnand %p485_p8, %p479_p5 }
  0x33   :  { %489 = shalt.err (!%p486_p9)
}
  0x34   :  { %51 = dma.hbm_to_vmem [thread:$0]  %s601_s3, 1024, %s46_s19, [#allocation6], %s495_s12, %s495_s12, %s496_s13  }
  0x35   :  { %490 = dma.done.wait [#allocation4], 64  }
  0x36   :  { %491 = vsyncadd [#allocation4], 4294967232 }
  0x37   :  { %492 = dma.done.wait [#allocation6], 1856  }
  0x38   :  { %493 = vsyncadd [#allocation6], 4294965440  ;;  %v499_v1 = vmov 0.0   ;;  %vm500_vm0 = vmmov 0   ;;  %v405_v2 = vld [vmem:[#allocation5] sm:$0xff]   ;;  %v406_v3 = vld [vmem:[#allocation5 + $0x8] sm:$0xff]  }
  0x39   :  { %360 = vmatprep.subr.bf16.mxu0 %v499_v1  ;;  %374 = vmatprep.mubr.msk.bf16.mxu0 %vm500_vm0, %v499_v1  ;;  %v407_v4 = vld [vmem:[#allocation5 + $0x10] sm:$0xff]   ;;  %v413_v6 = vld [vmem:[#allocation7 + $0x8] sm:$0xff]   ;;  %v414_v8 = vld [vmem:[#allocation7 + $0x10] sm:$0xff]   ;;  %vm132_vm1 = vcmask 1041408   ;;  %vm128_vm2 = vcmask 818176   ;;  %vm314_vm3 = vcmask 7168  }
  0x3a   :  { %378 = vmatprep.subr.bf16.mxu1 %v499_v1  ;;  %394 = vmatprep.mubr.msk.bf16.mxu1 %vm500_vm0, %v499_v1  ;;  %v412_v5 = vld [vmem:[#allocation7] sm:$0xff]   ;;  %v409_v9 = vld [vmem:[#allocation5 + $0x20] sm:$0xff]   ;;  %v415_v10 = vld [vmem:[#allocation7 + $0x18] sm:$0xff]  }
  0x3b   :  { %361 = vmatpush3.bf16.msra.mxu0 %v405_v2  ;;  %379 = vmatpush3.bf16.msra.mxu1 %v412_v5  ;;  %v408_v7 = vld [vmem:[#allocation5 + $0x18] sm:$0xff]   ;;  %v410_v11 = vld [vmem:[#allocation5 + $0x28] sm:$0xff]   ;;  %v411_v12 = vld [vmem:[#allocation5 + $0x30] ss:$0 sps:$4 sm:$0x33]  }
  0x3c   :  { %362 = vmatprep.subr.bf16.mxu0 %v499_v1  ;;  %380 = vmatprep.subr.bf16.mxu1 %v499_v1  ;;  %v416_v13 = vld [vmem:[#allocation7 + $0x20] sm:$0xff]   ;;  %v134_v14 = vsel %vm132_vm1, %v411_v12, 0  ;;  %v417_v15 = vld [vmem:[#allocation7 + $0x28] sm:$0xff]   ;;  %v418_v17 = vld [vmem:[#allocation7 + $0x30] sm:$0xff]  }
  0x3d   :  { %v68_v16 = vld [vmem:[#allocation3] sm:$0xf]  ;;  %v419_v18 = vld [vmem:[#allocation7 + $0x38] sm:$0xff]   ;;  %v322_v19 = vld [vmem:[%s600_s2] ss:$0 sm:$0xff] }
  0x3e   :  { %v331_v27 = vld [vmem:[%s602_s4] ss:$0 sm:$0xff] }
  0x3f   :  { %363 = vmatpush3.bf16.msra.mxu0 %v406_v3  ;;  %381 = vmatpush3.bf16.msra.mxu1 %v413_v6  ;;  %v340_v32 = vld [vmem:[%s603_s5] ss:$0 sm:$0xff] }
  0x40   :  { %364 = vmatprep.subr.bf16.mxu0 %v499_v1  ;;  %382 = vmatprep.subr.bf16.mxu1 %v499_v1  ;;  %v341_v36 = vld [vmem:[#allocation2] ss:$0 sm:$0xff] }
  0x43   :  { %365 = vmatpush3.bf16.msra.mxu0 %v407_v4  ;;  %383 = vmatpush3.bf16.msra.mxu1 %v414_v8 }
  0x44   :  { %366 = vmatprep.subr.bf16.mxu0 %v499_v1  ;;  %384 = vmatprep.subr.bf16.mxu1 %v499_v1 }
  0x47   :  { %367 = vmatpush3.bf16.msra.mxu0 %v408_v7  ;;  %385 = vmatpush3.bf16.msra.mxu1 %v415_v10 }
  0x48   :  { %368 = vmatprep.subr.bf16.mxu0 %v499_v1  ;;  %386 = vmatprep.subr.bf16.mxu1 %v499_v1 }
  0x4b   :  { %369 = vmatpush3.bf16.msra.mxu0 %v409_v9  ;;  %387 = vmatpush3.bf16.msra.mxu1 %v416_v13 }
  0x4c   :  { %370 = vmatprep.subr.bf16.mxu0 %v499_v1  ;;  %388 = vmatprep.subr.bf16.mxu1 %v499_v1 }
  0x4f   :  { %371 = vmatpush3.bf16.msra.mxu0 %v410_v11  ;;  %389 = vmatpush3.bf16.msra.mxu1 %v417_v15 }
  0x50   :  { %372 = vmatprep.subr.bf16.mxu0 %v499_v1  ;;  %390 = vmatprep.subr.bf16.mxu1 %v499_v1 }
  0x53   :  { %373 = vmatpush3.bf16.msra.mxu0 %v134_v14  ;;  %391 = vmatpush3.bf16.msra.mxu1 %v418_v17 }
  0x54   :  { %392 = vmatprep.subr.bf16.mxu1 %v499_v1 }
  0x56   :  { %375 = vmatmul.mubr.msk.bf16.vlgmr.msra.gmra.mrb[0].mxu0 %vm128_vm2, %v68_v16 }
  0x57   :  { %393 = vmatpush3.bf16.msra.mxu1 %v419_v18 }
 0x129   :  { %v170_v20 = vpop.f32.mrb[0].mxu0 }
 0x12a   :  { %v171_v21 = vadd.f32 %v322_v19, %v170_v20  ;;  %v376_v22 = vpop.f32.mrb[1].mxu0 }
 0x12b   :  { %v173_v23 = vpop.f32.mrb[2].mxu0 }
 0x12c   :  { %v176_v24 = vmax.f32 %v171_v21, 0.0  ;;  %v377_v25 = vpop.f32.mrb[3].mxu0 }
 0x12e   :  { %v177_v26 = vpack.c.bf16 %v176_v24, %v176_v24 }
 0x130   :  { %395 = vmatmul.mubr.bf16.vlgmr.msra.gmra.mrb[0].mxu1 %v177_v26 }
 0x203   :  { %v283_v28 = vpop.f32.mrb[0].mxu1 }
 0x204   :  { %v284_v29 = vadd.f32 %v331_v27, %v283_v28  ;;  %v396_v30 = vpop.f32.mrb[1].mxu1 }
 0x205   :  { %v286_v31 = vpop.f32.mrb[2].mxu1 }
 0x206   :  { %v289_v33 = vmax.f32 %v284_v29, 0.0  ;;  %v397_v34 = vpop.f32.mrb[3].mxu1 }
 0x208   :  { %v297_v35 = vmul.f32 %v340_v32, %v289_v33 }
 0x20a   :  { %298 = vadd.xlane.f32.xlu0 %v297_v35 }
 0x297   :  { %v299_v37 = vpop.xlane.xlu0 %298 }
 0x298   :  { %v307_v38 = vadd.f32 %v341_v36, %v299_v37 }
 0x29a   :  { %v342_v39 = vmul.f32 -1.442695, %v307_v38 }
 0x29c   :  { %420 = vpow2.f32 %v342_v39 }
 0x2a6   :  { %v421_v40 = vpop.eup %420 }
 0x2a7   :  { %v311_v41 = vadd.f32 1.0, %v421_v40 }
 0x2a9   :  { %422 = vrcp.f32 %v311_v41 }
 0x2b3   :  { %v423_v42 = vpop.eup %422 }
 0x2b4   :  { %315 = vst.msk [vmem:[%s605_s7] sm:$0xff] %vm314_vm3, %v423_v42 }
 0x2b5   :  { %320 = vsyncpa [#allocation4], 1 }
 0x2b6   :  { %321 = vsyncpa [#allocation6], 1 }

</bundles_post_ra>
